<compile_context>
chip_gen: v7x
topology: tpu7x:2x2x1
jax: 0.10.0
libtpu: 0.0.40
codegen_flags: <defaults>
</compile_context>

<pallas_src>
import jax
import jax.numpy as jnp
from jax.experimental import pallas as pl
from jax.experimental.pallas import tpu as pltpu


def conv1x1_bias_add_kernel(x_ref, w_ref, b_ref, res_ref, o_ref):
    # x_ref:   (C_in, tL)    f32 — one batch element, one lane-dense L tile
    # w_ref:   (C_out, C_in) f32 — resident across all grid steps
    # b_ref:   (C_out, 1)    f32 — resident across all grid steps
    # res_ref: (C_out, tL)   f32 — residual tile
    # o_ref:   (C_out, tL)   f32
    t = jnp.dot(w_ref[...], x_ref[...], preferred_element_type=jnp.float32)  # MXU
    # Single bias broadcast per step (no batch loop -> no redundant broadcasts).
    o_ref[...] = t + b_ref[...] + res_ref[...]


def _pick_tile_l(L, C_in, C_out, *, budget_bytes=12 * 1024 * 1024):
    """Largest lane-dense L tile whose per-step VMEM footprint fits the budget.

    Budget of 12 MiB fits v5e's 16 MiB scoped-VMEM default and leaves ample
    headroom on v7x (64 MiB physical / 32 MiB default scoped), so no
    vmem_limit_bytes override is needed on any generation.
    """
    def step_bytes(t):
        return (2 * C_in * t * 4            # x block, double-buffered
                + 2 * C_out * t * 4         # res block, double-buffered
                + 2 * C_out * t * 4         # out block, double-buffered
                + 2 * (C_out * C_in + C_out) * 4)   # resident w + b
    t = min(L, 2048)
    while t > 128 and step_bytes(t) > budget_bytes:
        t //= 2
    return t


def decoder_ai85cnn_cma(x, w, b, res):
    """Conv1d(C_in->C_out, kernel_size=1, bias) + residual add, all in f32.

    x: (N, C_in, L); w: (C_out, C_in); b: (C_out,); res: (N, C_out, L).
    Returns f32 (N, C_out, L).
    """
    N, C_in, L = x.shape
    C_out = w.shape[0]

    b2d = b.reshape(C_out, 1)                 # tiny; keeps bias 2-D for VMEM layout

    tL = _pick_tile_l(L, C_in, C_out)
    grid = (N, pl.cdiv(L, tL))                # ragged last L tile is handled by Pallas

    cost = pl.CostEstimate(
        flops=2 * N * C_out * C_in * L,
        transcendentals=0,
        bytes_accessed=4 * (x.size + w.size + b.size + res.size + N * C_out * L),
    )

    return pl.pallas_call(
        conv1x1_bias_add_kernel,
        out_shape=jax.ShapeDtypeStruct((N, C_out, L), jnp.float32),
        grid_spec=pl.GridSpec(
            grid=grid,
            in_specs=[
                pl.BlockSpec((pl.Squeezed(), C_in, tL), lambda n, l: (n, 0, l)),   # x
                pl.BlockSpec((C_out, C_in), lambda n, l: (0, 0)),                  # w (resident)
                pl.BlockSpec((C_out, 1), lambda n, l: (0, 0)),                     # b (resident)
                pl.BlockSpec((pl.Squeezed(), C_out, tL), lambda n, l: (n, 0, l)),  # res
            ],
            out_specs=pl.BlockSpec((pl.Squeezed(), C_out, tL), lambda n, l: (n, 0, l)),
        ),
        compiler_params=pltpu.CompilerParams(
            dimension_semantics=("parallel", "parallel")),
        cost_estimate=cost,
    )(x, w, b2d, res)


if __name__ == "__main__":
    # Shapes implied by the module: Conv1d(64 -> 112, k=1), residual add.
    N, C_IN, C_OUT, L = 2, 64, 112, 128

    key = jax.random.PRNGKey(0)
    kx, kw, kb, kr = jax.random.split(key, 4)

    x = jax.random.normal(kx, (N, C_IN, L), dtype=jnp.float32)
    # Deterministic parameter init (synthetic, not a checkpoint).
    w = jax.random.normal(kw, (C_OUT, C_IN), dtype=jnp.float32) * 0.05
    b = jax.random.normal(kb, (C_OUT,), dtype=jnp.float32) * 0.05
    res = jax.random.normal(kr, (N, C_OUT, L), dtype=jnp.float32)

    y = jax.block_until_ready(decoder_ai85cnn_cma(x, w, b, res))

    # Exact f32 reference (module semantics). All kernel data stays f32; the only
    # deviation is the TPU MXU's default f32 matmul precision inside the dot.
    y_ref = (jnp.einsum("oc,ncl->nol", w, x, precision=jax.lax.Precision.HIGHEST)
             + b[None, :, None] + res)

    assert y.shape == (N, C_OUT, L) and y.dtype == jnp.float32
    assert jnp.allclose(y, y_ref, atol=1e-2, rtol=1e-2)
    print("KERNEL_OK")
</pallas_src>

<mosaic_0001>
module attributes {stable_mosaic.version = 11 : i64} {
  func.func @conv1x1_bias_add_kernel(%arg0: i32, %arg1: i32, %arg2: memref<1x64x128xf32, #tpu.memory_space<vmem>>, %arg3: memref<112x64xf32, #tpu.memory_space<vmem>>, %arg4: memref<112x1xf32, #tpu.memory_space<vmem>>, %arg5: memref<1x112x128xf32, #tpu.memory_space<vmem>>, %arg6: memref<1x112x128xf32, #tpu.memory_space<vmem>>) attributes {dimension_semantics = [#tpu.dimension_semantics<parallel>, #tpu.dimension_semantics<parallel>], iteration_bounds = array<i64: 2, 1>, scalar_prefetch = 0 : i64, scratch_operands = 0 : i64, tpu.core_type = #tpu.core_type<tc>, window_params = [{transform_indices = @transform_0, window_bounds = array<i64: 1, 64, 128>}, {pipeline_mode = #tpu.pipeline_mode<synchronous>, transform_indices = @transform_1, window_bounds = array<i64: 112, 64>}, {pipeline_mode = #tpu.pipeline_mode<synchronous>, transform_indices = @transform_2, window_bounds = array<i64: 112, 1>}, {transform_indices = @transform_3, window_bounds = array<i64: 1, 112, 128>}, {transform_indices = @transform_4, window_bounds = array<i64: 1, 112, 128>}]} {
    %c0 = arith.constant 0 : index
    %c0_0 = arith.constant 0 : index
    %0 = vector.load %arg3[%c0, %c0_0] : memref<112x64xf32, #tpu.memory_space<vmem>>, vector<112x64xf32>
    %c0_1 = arith.constant 0 : index
    %c0_2 = arith.constant 0 : index
    %c0_3 = arith.constant 0 : index
    %1 = vector.load %arg2[%c0_1, %c0_2, %c0_3] : memref<1x64x128xf32, #tpu.memory_space<vmem>>, vector<1x64x128xf32>
    %2 = vector.shape_cast %1 : vector<1x64x128xf32> to vector<64x128xf32>
    %cst = arith.constant dense<0.000000e+00> : vector<112x128xf32>
    %3 = tpu.matmul %0, %2, %cst {dimension_numbers = #tpu.dot_dimension_numbers<[1], [0], [0], [1], [0, 0, 1, 1], [], []>} : vector<112x64xf32>, vector<64x128xf32>, vector<112x128xf32> -> vector<112x128xf32>
    %c0_4 = arith.constant 0 : index
    %c0_5 = arith.constant 0 : index
    %4 = vector.load %arg4[%c0_4, %c0_5] : memref<112x1xf32, #tpu.memory_space<vmem>>, vector<112x1xf32>
    %5 = vector.broadcast %4 : vector<112x1xf32> to vector<112x128xf32>
    %6 = arith.addf %3, %5 : vector<112x128xf32>
    %c0_6 = arith.constant 0 : index
    %c0_7 = arith.constant 0 : index
    %c0_8 = arith.constant 0 : index
    %7 = vector.load %arg5[%c0_6, %c0_7, %c0_8] : memref<1x112x128xf32, #tpu.memory_space<vmem>>, vector<1x112x128xf32>
    %8 = vector.shape_cast %7 : vector<1x112x128xf32> to vector<112x128xf32>
    %9 = arith.addf %6, %8 : vector<112x128xf32>
    %c0_9 = arith.constant 0 : index
    %c0_10 = arith.constant 0 : index
    %c0_11 = arith.constant 0 : index
    %10 = vector.load %arg6[%c0_9, %c0_10, %c0_11] : memref<1x112x128xf32, #tpu.memory_space<vmem>>, vector<1x112x128xf32>
    %11 = vector.shape_cast %10 : vector<1x112x128xf32> to vector<112x128xf32>
    %12 = vector.shape_cast %9 : vector<112x128xf32> to vector<1x112x128xf32>
    tpu.vector_store %arg6[%c0_9, %c0_10, %c0_11], %12 {strides = array<i32>} : memref<1x112x128xf32, #tpu.memory_space<vmem>>, vector<1x112x128xf32>,
    return
  }
  func.func @transform_0(%arg0: i32, %arg1: i32) -> (i32, i32, i32) {
    %c0_i32 = arith.constant 0 : i32
    %c0_i32_0 = arith.constant 0 : i32
    return %arg0, %c0_i32, %arg1 : i32, i32, i32
  }
  func.func @transform_1(%arg0: i32, %arg1: i32) -> (i32, i32) {
    %c0_i32 = arith.constant 0 : i32
    %c0_i32_0 = arith.constant 0 : i32
    %c0_i32_1 = arith.constant 0 : i32
    return %c0_i32, %c0_i32_0 : i32, i32
  }
  func.func @transform_2(%arg0: i32, %arg1: i32) -> (i32, i32) {
    %c0_i32 = arith.constant 0 : i32
    %c0_i32_0 = arith.constant 0 : i32
    %c0_i32_1 = arith.constant 0 : i32
    return %c0_i32, %c0_i32_0 : i32, i32
  }
  func.func @transform_3(%arg0: i32, %arg1: i32) -> (i32, i32, i32) {
    %c0_i32 = arith.constant 0 : i32
    %c0_i32_0 = arith.constant 0 : i32
    return %arg0, %c0_i32, %arg1 : i32, i32, i32
  }
  func.func @transform_4(%arg0: i32, %arg1: i32) -> (i32, i32, i32) {
    %c0_i32 = arith.constant 0 : i32
    %c0_i32_0 = arith.constant 0 : i32
    return %arg0, %c0_i32, %arg1 : i32, i32, i32
  }
}

</mosaic_0001>

<bundles_post_ra>
// kernel: tpu_custom_call.1
= control target key start
LH: loop header
LB: loop body
LE: loop exit
PB: predicated region body
PF: predicated region fallthrough
CT: control target
= control target key end

     0   :  { %9 = vsyncpa [#allocation3], 0  ;;  %s1358_s0 = inlined_call_operand.hbm [shape: f32[2,64,128], index: 0, kind: input, shape index: {}]   ;;  %s1359_s1 = inlined_call_operand.vmem [shape: f32[112,64], index: 1, kind: input, shape index: {}]   ;;  %s1360_s2 = inlined_call_operand.vmem [shape: f32[112,1], index: 2, kind: input, shape index: {}]   ;;  %s1361_s3 = inlined_call_operand.vmem [shape: f32[2,112,128], index: 3, kind: input, shape index: {}]   ;;  %s1362_s4 = inlined_call_operand.hbm [shape: f32[2,112,128], index: 4, kind: output, shape index: {}]  }
   0x1   :  { %11 = vsyncpa [#allocation3 + $0x1], 0 }
   0x2   :  { %12 = vsyncpa [#allocation4], 0 }
   0x3   :  { %14 = vsyncpa [#allocation4 + $0x1], 0  ;;  %s1037_s15 = smov 0   ;;  %s1039_s16 = smov 0  }
   0x4   :  { %s1041_s17 = smov 0   ;;  %s1043_s18 = smov 0  }
   0x5   :  { %s1045_s19 = smov 0   ;;  %s1047_s20 = smov 0  }
   0x6 LB: > { %s708_s21 = sadd.s32 4294967295, %s1003_s20   ;;  %s709_s22 = sadd.s32 4294967294, %s1003_s20   ;;  %s1003_s20 = sphi %s1047_s20, %s20_s20   ;;  %s999_s19 = sphi %s1045_s19, %s1377_s19   ;;  %s995_s18 = sphi %s1043_s18, %s1376_s18   ;;  %s991_s17 = sphi %s1041_s17, %s1375_s17   ;;  %s987_s16 = sphi %s1039_s16, %s1374_s16   ;;  %s983_s15 = sphi %s1037_s15, %s1373_s15  }
   0x7   : > { %s32_s23 = sadd.s32 1, %s999_s19  ;;  %s41_s24 = sadd.s32 1, %s991_s17 }
   0x8   : > { %p34_p0 = scmp.ge.s32.totalorder %s32_s23, 2  ;;  %p48_p1 = scmp.ne.s32.totalorder %s991_s17, %s987_s16 }
   0x9   : > { %p49_p2 = scmp.eq.s32.totalorder %s1003_s20, 0  ;;  %p54_p3 = scmp.ne.s32.totalorder %s987_s16, %s983_s15 }
   0xa   : > { %s1379_s23 = smov (%p34_p0, %s32_s23), 0  ;;  %p55_p5 = scmp.eq.s32.totalorder %s708_s21, 0 }
   0xb   : > { %p1078_p4 = por %p49_p2, %p48_p1  ;;  %s36_s26 = ssub.s32 %s999_s19, %s1379_s23 }
   0xc   : > { %p150_p6 = scmp.eq.s32.totalorder %s708_s21, 1  ;;  %p39_p7 = scmp.eq.s32.totalorder %s36_s26, 0 }
   0xd   : > { %p1084_p8 = por %p55_p5, %p54_p3  ;;  %p156_p10 = scmp.eq.s32.totalorder %s709_s22, 1 }
   0xe   : > { %p1088_p9 = por %p150_p6, %p48_p1  ;;  %p834_p13 = scmp.lt.s32.totalorder %s1003_s20, 2 }
   0xf   : > { %s1093_s29 = scalar_select %p39_p7, %s991_s17, %s41_s24  }
  0x10   : > { %s1366_s28 = scalar_select %p1088_p9, 1, 0 }
  0x11   : > { %p1095_p11 = por %p156_p10, %p54_p3  ;;  %s182_s5 = sand.u32 1, %s991_s17  }
  0x12   : > { %s712_s6 = sshll.u32 %s182_s5, 6  ;;  %s735_s7 = sshll.u32 %s999_s19, 10 }
  0x13   : > { %s1367_s30 = scalar_select %p1095_p11, 1, 0 }
  0x14   : > { %s1106_s10 = scalar_lea.hbm %s1358_s0, %s735_s7  ;;  %s186_s11 = scalar_lea.vmem [#allocation2], %s712_s6 }
  0x15   : > { %s194_s12 = sshll.u32 %s186_s11, 4  ;;  %p1112_p0 = pnand %p834_p13, %p1078_p4  ;;  %s1108_s12 = int_to_ptr.vmem [resolvable:$true] %s194_s12 }
  0x16   : > { %s1117_s14 = scalar_lea.sflag [#allocation3], %s182_s5  ;;  %s891_s21 = scalar_lea.hbm %s1106_s10, 1024 }
  0x17   : > { %p892_p2 = scmp.ne.s32.totalorder %s1106_s10, %s891_s21  ;;  %p893_p3 = pneg %p1112_p0 }
  0x18   : > { %s896_s25 = scalar_lea.hbm %s1358_s0, 2048  ;;  %p897_p4 = scmp.lt.u32.totalorder %s1106_s10, %s1358_s0 }
  0x19   : > { %p894_p5 = pnand %p893_p3, %p892_p2  ;;  %p898_p7 = scmp.lt.u32.totalorder %s896_s25, %s891_s21 }
  0x1a   : > { %p900_p13 = scmp.lt.u32.totalorder %s891_s21, %s1106_s10 }
  0x1b   : > { %p895_p6 = pneg %p894_p5  ;;  %p899_p10 = por %p898_p7, %p897_p4 }
  0x1d   : > { %p901_p12 = por %p900_p13, %p899_p10 }
  0x1f   : > { %p902_p1 = pnand %p901_p12, %p895_p6 }
  0x21   : > { %905 = shalt.err (!%p902_p1)
}
  0x22   : > { %s906_s5 = scalar_lea.vmem %s1108_s12, 1024  ;;  %s1005_s7 = smov [#allocation2]  }
  0x23   : > { %p907_p2 = scmp.ne.s32.totalorder %s1108_s12, %s906_s5  ;;  %s911_s8 = sshll.u32 %s1005_s7, 4  ;;  %s912_s8 = int_to_ptr.vmem [resolvable:$false] %s911_s8 }
  0x24   : > { %s913_s9 = scalar_lea.vmem %s912_s8, 2048  ;;  %p914_p9 = scmp.lt.s32.totalorder %s1108_s12, %s912_s8 }
  0x25   : > { %p909_p5 = pnand %p907_p2, %p893_p3  ;;  %p915_p4 = scmp.lt.s32.totalorder %s913_s9, %s906_s5 }
  0x27   : > { %p910_p11 = pneg %p909_p5  ;;  %p916_p7 = por %p915_p4, %p914_p9 }
  0x29   : > { %p917_p10 = pnand %p916_p7, %p910_p11 }
  0x2b   : > { %920 = shalt.err (!%p917_p10)
}
  0x2c   : > { %s1006_s11 = smov 128   ;;  %s1007_s21 = smov 8  }
  0x2d   : > { %829 = dma.hbm_to_vmem [thread:$0]  (!%p1112_p0), %s1106_s10, 1024, %s1108_s12, %s1117_s14, %s1006_s11, %s1006_s11, %s1007_s21  }
  0x2e   : > { %p213_p12 = scmp.lt.s32.totalorder %s1003_s20, 3  ;;  %p1369_p1 = scmp.ge.s32.totalorder %s1003_s20, 1 }
  0x30   : > { %p214_p3 = pnand %p1369_p1, %p213_p12 }
  0x31   : > { %s1149_s22 = sand.u32 (!%p214_p3), 1, %s987_s16  }
  0x32   : > { %217 = sbr.rel (%p214_p3) target bundleno = 321 (0x141), region = 36  ;;  %s716_s24 = sshll.u32 (!%p214_p3), %s1149_s22, 6 }
  0x33   : > { %s220_s25 = scalar_lea.sflag (!%p214_p3), [#allocation3], %s1149_s22  ;;  %s223_s26 = scalar_lea.vmem (!%p214_p3), [#allocation2], %s716_s24 }
  0x39   : > { %974 = dma.done.wait (%p1084_p8), %s220_s25, 1024  }
  0x3a   : > { %976 = vsyncadd (%p1084_p8), %s220_s25, 4294966272  ;;  %v1008_v0 = vmov 0   ;;  %v278_v1 = vld [vmem:[%s223_s26] sm:$0xff]  ;;  %v279_v2 = vld [vmem:[%s223_s26 + $0x8] sm:$0xff]  ;;  %vm370_vm0 = vcmask 523264   ;;  %p256_p8 = scmp.lt.s32.totalorder %s995_s18, 1 }
  0x3b   : > { %890 = vset.pattern.permute.xlu1 %v1008_v0  ;;  %889 = vset.pattern.permute.xlu0 %v1008_v0  ;;  %v280_v3 = vld [vmem:[%s223_s26 + $0x10] sm:$0xff]  ;;  %v795_v4 = vpack.c.bf16 %v279_v2, %v278_v1  ;;  %v281_v5 = vld [vmem:[%s223_s26 + $0x18] sm:$0xff]  ;;  %v282_v7 = vld [vmem:[%s223_s26 + $0x20] sm:$0xff]  ;;  %s819_s12 = smul.u32 112, %s1149_s22  ;;  %s591_s7 = scalar_lea.sflag [#allocation4], %s1149_s22 }
  0x3c   : > { %v799_v6 = vpack.c.bf16 %v281_v5, %v280_v3  ;;  %v283_v8 = vld [vmem:[%s223_s26 + $0x28] sm:$0xff]  ;;  %v264_v9 = vld [vmem:[%s1359_s1] sm:$0xff]  ;;  %v284_v12 = vld [vmem:[%s223_s26 + $0x30] sm:$0xff]  ;;  %s257_s21 = scalar_select %p256_p8, %s995_s18, 1 }
  0x3d   : > { %796 = vmatprep.subr.bf16.mxu0 %v795_v4  ;;  %811 = vmatprep.subr.bf16.mxu1 %v795_v4  ;;  %v272_v10 = vld [vmem:[%s1359_s1 + $0x40] sm:$0xff]  ;;  %v803_v11 = vpack.c.bf16 %v283_v8, %v282_v7  ;;  %v285_v13 = vld [vmem:[%s223_s26 + $0x38] sm:$0xff]  ;;  %v288_v14 = vld [vmem:[%s1360_s2 + $0x10] sm:$0xff]  ;;  %s1275_s27 = scalar_lea.vmem [#allocation5], %s819_s12  ;;  %s821_s13 = smul.u32 1792, %s995_s18 }
  0x3e   : > { %798 = vmatpush3.bf16.msra.mxu0 %v795_v4  ;;  %815 = vmatpush3.bf16.msra.mxu1 %v795_v4  ;;  %v286_v15 = vld [vmem:[%s1360_s2] sm:$0xff]  ;;  %v807_v16 = vpack.c.bf16 %v285_v13, %v284_v12  ;;  %v289_v17 = vld [vmem:[%s1360_s2 + $0x18] sm:$0xff]  ;;  %v287_v18 = vld [vmem:[%s1360_s2 + $0x8] sm:$0xff]  ;;  %s820_s24 = smul.u32 112, %s257_s21  ;;  %s605_s14 = sshll.u32 %s1275_s27, 4  ;;  %s1307_s14 = int_to_ptr.vmem [resolvable:$true] %s605_s14 }
  0x3f   : > { %800 = vmatprep.subr.bf16.mxu0 %v799_v6  ;;  %812 = vmatprep.subr.bf16.mxu1 %v799_v6  ;;  %v291_v19 = vld [vmem:[%s1360_s2 + $0x28] sm:$0xff]  ;;  %v290_v20 = vld [vmem:[%s1360_s2 + $0x20] sm:$0xff]  ;;  %v266_v23 = vld [vmem:[%s1359_s1 + $0x10] sm:$0xff]  ;;  %s1305_s5 = scalar_lea.hbm %s1362_s4, %s821_s13  ;;  %s921_s8 = scalar_lea.vmem %s1307_s14, 1792 }
  0x40   : > { %774 = vmatprep.mubr.msk.f32.mxu0 %vm370_vm0, %v264_v9  ;;  %786 = vmatprep.mubr.msk.f32.mxu1 %vm370_vm0, %v272_v10  ;;  %v265_v21 = vld [vmem:[%s1359_s1 + $0x8] sm:$0xff]  ;;  %v274_v24 = vld [vmem:[%s1359_s1 + $0x50] sm:$0xff]  ;;  %v293_v25 = vld [vmem:[%s1360_s2 + $0x38] sm:$0xff]  ;;  %s1266_s10 = scalar_lea.vmem %s1361_s3, %s820_s24  ;;  %p922_p9 = scmp.ne.s32.totalorder %s1307_s14, %s921_s8 }
  0x41   : > { %312 = vperm.xlu1 %890, %v288_v14   ;;  %302 = vperm.xlu0 %889, %v286_v15   ;;  %v273_v22 = vld [vmem:[%s1359_s1 + $0x48] sm:$0xff]  ;;  %v292_v26 = vld [vmem:[%s1360_s2 + $0x30] sm:$0xff]  ;;  %v267_v27 = vld [vmem:[%s1359_s1 + $0x18] sm:$0xff]  ;;  %p1370_p11 = scmp.ne.s32.totalorder %s1366_s28, 0  ;;  %s1009_s9 = smov [#allocation5]  }
  0x42   : > { %802 = vmatpush3.bf16.msra.mxu0 %v799_v6  ;;  %816 = vmatpush3.bf16.msra.mxu1 %v799_v6  ;;  %v275_v28 = vld [vmem:[%s1359_s1 + $0x58] sm:$0xff]  ;;  %v268_v29 = vld [vmem:[%s1359_s1 + $0x20] sm:$0xff]  ;;  %v295_v31 = vld [vmem:[%s1360_s2 + $0x48] sm:$0xff]  ;;  %s925_s11 = sshll.u32 %s1009_s9, 4  ;;  %s926_s11 = int_to_ptr.vmem [resolvable:$false] %s925_s11 }
  0x43   : > { %804 = vmatprep.subr.bf16.mxu0 %v803_v11  ;;  %813 = vmatprep.subr.bf16.mxu1 %v803_v11  ;;  %v276_v30 = vld [vmem:[%s1359_s1 + $0x60] sm:$0xff]  ;;  %v269_v33 = vld [vmem:[%s1359_s1 + $0x28] sm:$0xff]  ;;  %v270_v35 = vld [vmem:[%s1359_s1 + $0x30] sm:$0xff]  ;;  %p923_p0 = pnand %p922_p9, %p1370_p11  ;;  %s927_s21 = scalar_lea.vmem %s926_s11, 3584 }
  0x44   : > { %v294_v32 = vld [vmem:[%s1360_s2 + $0x40] sm:$0xff]  ;;  %v277_v34 = vld [vmem:[%s1359_s1 + $0x68] sm:$0xff]  ;;  %v297_v36 = vld [vmem:[%s1360_s2 + $0x58] sm:$0xff]  ;;  %p928_p13 = scmp.lt.s32.totalorder %s1307_s14, %s926_s11  ;;  %p929_p2 = scmp.lt.s32.totalorder %s927_s21, %s921_s8 }
  0x45   : > { %317 = vperm.xlu1 %890, %v289_v17   ;;  %307 = vperm.xlu0 %889, %v287_v18   ;;  %v296_v37 = vld [vmem:[%s1360_s2 + $0x50] sm:$0xff]  ;;  %v271_v38 = vld [vmem:[%s1359_s1 + $0x38] sm:$0xff]  ;;  %v299_v39 = vld [vmem:[%s1360_s2 + $0x68] sm:$0xff]  ;;  %p924_p6 = pneg %p923_p0 }
  0x46   : > { %806 = vmatpush3.bf16.msra.mxu0 %v803_v11  ;;  %817 = vmatpush3.bf16.msra.mxu1 %v803_v11  ;;  %v298_v40 = vld [vmem:[%s1360_s2 + $0x60] sm:$0xff]  ;;  %v549_v54 = vld [vmem:[%s1266_s10 + $0x8] sm:$0xff]  ;;  %v551_v6 = vld [vmem:[%s1266_s10 + $0x18] sm:$0xff]  ;;  %p930_p5 = por %p929_p2, %p928_p13 }
  0x47   : > { %808 = vmatprep.subr.bf16.mxu0 %v807_v16  ;;  %814 = vmatprep.subr.bf16.mxu1 %v807_v16  ;;  %v557_v56 = vld [vmem:[%s1266_s10 + $0x48] sm:$0xff]  ;;  %v548_v60 = vld [vmem:[%s1266_s10] sm:$0xff]  ;;  %v559_v8 = vld [vmem:[%s1266_s10 + $0x58] sm:$0xff] }
  0x48   : > { %v556_v62 = vld [vmem:[%s1266_s10 + $0x40] sm:$0xff]  ;;  %v550_v12 = vld [vmem:[%s1266_s10 + $0x10] sm:$0xff]  ;;  %p931_p4 = pnand %p930_p5, %p924_p6 }
  0x49   : > { %327 = vperm.xlu1 %890, %v291_v19   ;;  %322 = vperm.xlu0 %889, %v290_v20   ;;  %v558_v14 = vld [vmem:[%s1266_s10 + $0x50] sm:$0xff] }
  0x4a   : > { %810 = vmatpush3.bf16.msra.mxu0 %v807_v16  ;;  %818 = vmatpush3.bf16.msra.mxu1 %v807_v16 }
  0x4d   : > { %775 = vmatmul.mubr.msk.f32.vlgmr.msra.gmra.mrb[0].mxu0 %vm370_vm0, %v265_v21  ;;  %787 = vmatmul.mubr.msk.f32.vlgmr.msra.gmra.mrb[0].mxu1 %vm370_vm0, %v273_v22 }
  0x4e   : > { %777 = vmatprep.mubr.msk.f32.mxu0 %vm370_vm0, %v266_v23  ;;  %789 = vmatprep.mubr.msk.f32.mxu1 %vm370_vm0, %v274_v24  ;;  %v553_v24 = vld [vmem:[%s1266_s10 + $0x28] sm:$0xff] }
  0x4f   : > { %337 = vperm.xlu1 %890, %v293_v25   ;;  %332 = vperm.xlu0 %889, %v292_v26   ;;  %v561_v26 = vld [vmem:[%s1266_s10 + $0x68] sm:$0xff] }
  0x51   : > { %778 = vmatmul.mubr.msk.f32.gmra.mrb[2].mxu0 %vm370_vm0, %v267_v27  ;;  %790 = vmatmul.mubr.msk.f32.gmra.mrb[2].mxu1 %vm370_vm0, %v275_v28 }
  0x52   : > { %780 = vmatprep.mubr.msk.f32.mxu0 %vm370_vm0, %v268_v29  ;;  %792 = vmatprep.mubr.msk.f32.mxu1 %vm370_vm0, %v276_v30  ;;  %v552_v30 = vld [vmem:[%s1266_s10 + $0x20] sm:$0xff] }
  0x53   : > { %347 = vperm.xlu1 %890, %v295_v31   ;;  %342 = vperm.xlu0 %889, %v294_v32   ;;  %v560_v32 = vld [vmem:[%s1266_s10 + $0x60] sm:$0xff] }
  0x55   : > { %781 = vmatmul.mubr.msk.f32.gmra.mrb[4].mxu0 %vm370_vm0, %v269_v33  ;;  %793 = vmatmul.mubr.msk.f32.gmra.mrb[4].mxu1 %vm370_vm0, %v277_v34 }
  0x56   : > { %783 = vmatprep.mubr.msk.f32.mxu0 %vm370_vm0, %v270_v35 }
  0x57   : > { %357 = vperm.xlu1 %890, %v297_v36   ;;  %352 = vperm.xlu0 %889, %v296_v37  }
  0x59   : > { %784 = vmatmul.mubr.msk.f32.gmra.mrb[6].mxu0 %vm370_vm0, %v271_v38 }
  0x5b   : > { %367 = vperm.xlu1 %890, %v299_v39   ;;  %362 = vperm.xlu0 %889, %v298_v40   ;;  %v555_v40 = vld [vmem:[%s1266_s10 + $0x38] sm:$0xff] }
  0xc0   : > { %v313_v41 = vpop.permute.xlu1 %312  ;;  %v303_v42 = vpop.permute.xlu0 %302 }
  0xc4   : > { %v318_v43 = vpop.permute.xlu1 %317  ;;  %v308_v44 = vpop.permute.xlu0 %307 }
  0xc8   : > { %v328_v45 = vpop.permute.xlu1 %327  ;;  %v1255_v46 = vpop.permute.xlu0 %322 }
  0xce   : > { %v1258_v47 = vpop.permute.xlu1 %337  ;;  %v1260_v48 = vpop.permute.xlu0 %332 }
  0xd2   : > { %v348_v49 = vpop.permute.xlu1 %347  ;;  %v343_v50 = vpop.permute.xlu0 %342 }
  0xd6   : > { %v358_v51 = vpop.permute.xlu1 %357  ;;  %v353_v52 = vpop.permute.xlu0 %352 }
  0xda   : > { %v368_v17 = vpop.permute.xlu1 %367  ;;  %v363_v18 = vpop.permute.xlu0 %362 }
 0x120   : > { %v776_v53 = vpop.f32.mrb[0].mxu0  ;;  %v788_v55 = vpop.f32.mrb[0].mxu1 }
 0x121   : > { %v485_v57 = vadd.f32 %v776_v53, %v308_v44  ;;  %v525_v58 = vadd.f32 %v788_v55, %v348_v49  ;;  %v479_v59 = vpop.f32.mrb[1].mxu0  ;;  %v519_v61 = vpop.f32.mrb[1].mxu1 }
 0x122   : > { %v480_v63 = vadd.f32 %v479_v59, %v303_v42  ;;  %v520_v0 = vadd.f32 %v519_v61, %v343_v50 }
 0x123   : > { %v563_v1 = vadd.f32 %v549_v54, %v485_v57  ;;  %v571_v2 = vadd.f32 %v557_v56, %v525_v58 }
 0x124   : > { %v562_v3 = vadd.f32 %v548_v60, %v480_v63  ;;  %v570_v4 = vadd.f32 %v556_v62, %v520_v0  ;;  %v779_v5 = vpop.f32.mrb[2].mxu0  ;;  %v791_v7 = vpop.f32.mrb[2].mxu1 }
 0x125   : > { %577 = vst [vmem:[%s1275_s27 + $0x8] sm:$0xff] %v563_v1  ;;  %585 = vst [vmem:[%s1275_s27 + $0x48] sm:$0xff] %v571_v2  ;;  %v495_v9 = vadd.f32 %v779_v5, %v318_v43  ;;  %v535_v10 = vadd.f32 %v791_v7, %v358_v51  ;;  %v489_v11 = vpop.f32.mrb[3].mxu0  ;;  %v529_v13 = vpop.f32.mrb[3].mxu1  ;;  %v554_v43 = vld [vmem:[%s1266_s10 + $0x30] sm:$0xff] }
 0x126   : > { %576 = vst [vmem:[%s1275_s27] sm:$0xff] %v562_v3  ;;  %584 = vst [vmem:[%s1275_s27 + $0x40] sm:$0xff] %v570_v4  ;;  %v490_v15 = vadd.f32 %v489_v11, %v313_v41  ;;  %v530_v16 = vadd.f32 %v529_v13, %v353_v52 }
 0x127   : > { %v565_v19 = vadd.f32 %v551_v6, %v495_v9  ;;  %v573_v20 = vadd.f32 %v559_v8, %v535_v10 }
 0x128   : > { %v564_v21 = vadd.f32 %v550_v12, %v490_v15  ;;  %v572_v22 = vadd.f32 %v558_v14, %v530_v16  ;;  %v782_v23 = vpop.f32.mrb[4].mxu0  ;;  %v794_v25 = vpop.f32.mrb[4].mxu1 }
 0x129   : > { %579 = vst [vmem:[%s1275_s27 + $0x18] sm:$0xff] %v565_v19  ;;  %587 = vst [vmem:[%s1275_s27 + $0x58] sm:$0xff] %v573_v20  ;;  %v505_v27 = vadd.f32 %v782_v23, %v328_v45  ;;  %v545_v28 = vadd.f32 %v794_v25, %v368_v17  ;;  %v499_v29 = vpop.f32.mrb[5].mxu0  ;;  %v539_v31 = vpop.f32.mrb[5].mxu1 }
 0x12a   : > { %578 = vst [vmem:[%s1275_s27 + $0x10] sm:$0xff] %v564_v21  ;;  %586 = vst [vmem:[%s1275_s27 + $0x50] sm:$0xff] %v572_v22  ;;  %v500_v33 = vadd.f32 %v499_v29, %v1255_v46  ;;  %v540_v34 = vadd.f32 %v539_v31, %v363_v18 }
 0x12b   : > { %v567_v35 = vadd.f32 %v553_v24, %v505_v27  ;;  %v575_v36 = vadd.f32 %v561_v26, %v545_v28 }
 0x12c   : > { %v566_v37 = vadd.f32 %v552_v30, %v500_v33  ;;  %v574_v38 = vadd.f32 %v560_v32, %v540_v34  ;;  %v785_v39 = vpop.f32.mrb[6].mxu0 }
 0x12d   : > { %581 = vst [vmem:[%s1275_s27 + $0x28] sm:$0xff] %v567_v35  ;;  %589 = vst [vmem:[%s1275_s27 + $0x68] sm:$0xff] %v575_v36  ;;  %v515_v41 = vadd.f32 %v785_v39, %v1258_v47  ;;  %v509_v42 = vpop.f32.mrb[7].mxu0 }
 0x12e   : > { %580 = vst [vmem:[%s1275_s27 + $0x20] sm:$0xff] %v566_v37  ;;  %588 = vst [vmem:[%s1275_s27 + $0x60] sm:$0xff] %v574_v38  ;;  %v510_v44 = vadd.f32 %v509_v42, %v1260_v48 }
 0x12f   : > { %v569_v45 = vadd.f32 %v555_v40, %v515_v41 }
 0x130   : > { %v568_v46 = vadd.f32 %v554_v43, %v510_v44 }
 0x131   : > { %583 = vst [vmem:[%s1275_s27 + $0x38] sm:$0xff] %v569_v45 }
 0x132   : > { %582 = vst [vmem:[%s1275_s27 + $0x30] sm:$0xff] %v568_v46 }
 0x133   : > { %934 = shalt.err (!%p931_p4)
}
 0x134   : > { %s935_s24 = scalar_lea.hbm %s1305_s5, 1792  ;;  %s939_s10 = scalar_lea.hbm %s1362_s4, 3584 }
 0x135   : > { %p936_p7 = scmp.ne.s32.totalorder %s1305_s5, %s935_s24  ;;  %p940_p1 = scmp.lt.u32.totalorder %s1305_s5, %s1362_s4 }
 0x136   : > { %p941_p3 = scmp.lt.u32.totalorder %s939_s10, %s935_s24  ;;  %p943_p9 = scmp.lt.u32.totalorder %s935_s24, %s1305_s5 }
 0x137   : > { %p937_p10 = pnand %p936_p7, %p1370_p11 }
 0x138   : > { %p942_p8 = por %p941_p3, %p940_p1 }
 0x139   : > { %p938_p12 = pneg %p937_p10 }
 0x13a   : > { %p944_p0 = por %p943_p9, %p942_p8 }
 0x13c   : > { %p945_p6 = pnand %p944_p0, %p938_p12 }
 0x13e   : > { %948 = shalt.err (!%p945_p6)
}
 0x13f   : > { %s1010_s13 = smov 128   ;;  %s1011_s18 = smov 8  }
 0x140   : > { %824 = dma.vmem_to_hbm [thread:$0]  (%p1370_p11), %s1307_s14, 1792, %s1305_s5, %s591_s7, %s1010_s13, %s1010_s13, %s1011_s18  }
 0x141 PF: > { %s620_s6 = sand.u32 1, %s983_s15   ;;  %p1371_p13 = scmp.ne.s32.totalorder %s1367_s30, 0 }
 0x142   : > { %p1372_p2 = scmp.ge.s32.totalorder %s1003_s20, 2  ;;  %s621_s8 = scalar_lea.sflag [#allocation4], %s620_s6 }
 0x144   : > { %p831_p5 = pnand %p1372_p2, %p1371_p13 }
 0x146   : > { %978 = dma.done.wait (!%p831_p5), %s621_s8, 1792  }
 0x147   : > { %980 = vsyncadd (!%p831_p5), %s621_s8, 4294965504  ;;  %s20_s20 = sadd.s32 1, %s1003_s20   ;;  %s1373_s15 = smov %s987_s16 }
 0x148   : > { %p17_p4 = scmp.ge.s32.totalorder %s20_s20, 4   ;;  %s1374_s16 = smov %s991_s17 }
 0x149   : > { %s1375_s17 = smov %s1093_s29  ;;  %s1376_s18 = smov %s999_s19 }
 0x14a   : > { %s1377_s19 = smov %s1379_s23  ;;  %19 = sbr.rel (!%p17_p4) target bundleno = 6 (0x6), region = 84 }
 0x151   :  { %626 = vsyncpa [#allocation3], 1 }
 0x152   :  { %628 = vsyncpa [#allocation3 + $0x1], 1 }
 0x153   :  { %629 = vsyncpa [#allocation4], 1 }
 0x154   :  { %631 = vsyncpa [#allocation4 + $0x1], 1 }

</bundles_post_ra>
